<compile_context>
chip_gen: v7x
topology: tpu7x:2x2x1
jax: 0.10.0
libtpu: 0.0.40
codegen_flags: <defaults>
</compile_context>

<pallas_src>
import numpy as np
import jax
import jax.numpy as jnp
from jax.experimental import pallas as pl
from jax.experimental.pallas import tpu as pltpu

DCT_N = 8            # DCT block size fixed by the module (8x8 unfold)
LANES = 128          # lane-dense kernel width (16 DCT blocks per vreg row)
MAX_TILE_ROWS = 4096 # 4096*128*4B = 2 MiB per f32 buffer (in+out double-buffered ~8 MiB)


def _dct_matrices():
    """Analytic torch_dct matrices: X = x @ A (dct, norm=None); y = X @ B (idct)."""
    n = np.arange(DCT_N, dtype=np.float64)
    k = np.arange(DCT_N, dtype=np.float64)
    ang = np.pi * (2.0 * n[:, None] + 1.0) * k[None, :] / (2.0 * DCT_N)   # [n, k]
    A = 2.0 * np.cos(ang)                            # dct(x)[k]  = 2 * sum_n x[n] cos(...)
    c = np.where(k == 0, 0.5, 1.0)
    B = (c[:, None] / DCT_N) * np.cos(ang.T)         # idct(X)[n] = (X0/2 + sum_k X_k cos)/N
    return A, B


def _build_kernel_matrix(new_w):
    """128x128 matrix applying dct->idct to every aligned 8-chunk along lanes.

    When new_w in {8, 16} the whole 8 x new_w block-row group occupies (a divisor
    of) one 128-lane row, so the unfold / block-raster reorder is folded into the
    matrix columns as well and the kernel output is already in block order.
    """
    A, B = _dct_matrices()
    C8 = A @ B                                       # round trip == I_8 analytically
    M = np.kron(np.eye(LANES // DCT_N), C8)          # block-diagonal, (128, 128)
    fused = new_w in (DCT_N, 2 * DCT_N)
    if fused and new_w == 2 * DCT_N:                 # new_w == 16: fold the reorder
        nbw = new_w // DCT_N                         # 2 blocks per image row
        i = np.arange(LANES)
        bw, r, cc = i // 64, (i // 8) % 8, i % 8     # block-order output coords
        sigma = (r * nbw + bw) * DCT_N + cc          # -> spatial column within the group
        M = M[:, sigma]
    return jnp.asarray(M, dtype=jnp.float32), fused


def _dct_roundtrip_kernel(x_ref, m_ref, o_ref):
    # One lane-dense MXU matmul per tile: (tile_rows, 128) @ (128, 128).
    o_ref[...] = jnp.dot(
        x_ref[...], m_ref[...], preferred_element_type=jnp.float32
    ).astype(o_ref.dtype)


def _dct_idct_flat(flat, m):
    """Apply dct->idct (and, if folded into `m`, the block reorder) to every
    aligned 8-chunk of a flat f32 array via a tiled, lane-dense Pallas kernel."""
    total = flat.shape[0]
    rows = -(-total // LANES)                        # cdiv
    num_tiles = -(-rows // MAX_TILE_ROWS)
    per_tile = -(-rows // num_tiles)
    tile_rows = ((per_tile + 7) // 8) * 8            # sublane dim: multiple of 8
    padded_rows = tile_rows * num_tiles
    pad_amt = padded_rows * LANES - total
    if pad_amt:
        flat = jnp.pad(flat, (0, pad_amt))           # zero rows are harmless, sliced off
    x2d = flat.reshape(padded_rows, LANES)

    y2d = pl.pallas_call(
        _dct_roundtrip_kernel,
        out_shape=jax.ShapeDtypeStruct((padded_rows, LANES), flat.dtype),
        grid_spec=pltpu.PrefetchScalarGridSpec(
            num_scalar_prefetch=0,
            grid=(num_tiles,),
            in_specs=[
                pl.BlockSpec((tile_rows, LANES), lambda i: (i, 0)),
                pl.BlockSpec((LANES, LANES), lambda i: (0, 0)),
            ],
            out_specs=pl.BlockSpec((tile_rows, LANES), lambda i: (i, 0)),
        ),
        compiler_params=pltpu.CompilerParams(
            dimension_semantics=("parallel",),
        ),
    )(x2d, m)

    out = y2d.reshape(-1)
    if pad_amt:
        out = out[:total]
    return out


@jax.jit
def dct_layer_forward(inputs):
    """JAX/Pallas equivalent of DCTLayer.forward.  inputs: (B, C, H, W) float32."""
    Bsz, C, H, W = inputs.shape
    new_h = H + (8 - H % 8) if H % 8 != 0 else H
    new_w = W + (8 - W % 8) if W % 8 != 0 else W
    if (new_h, new_w) != (H, W):
        inputs = jnp.pad(inputs, ((0, 0), (0, 0), (0, new_h - H), (0, new_w - W)))

    m, fused = _build_kernel_matrix(new_w)
    out_flat = _dct_idct_flat(inputs.reshape(-1), m)

    if fused:
        # Kernel output is already in block (unfold) raster order.
        return out_flat.reshape(Bsz, C, -1, new_h, new_w)

    # General width: one XLA pass reorders (b,c,bh,r,bw,cc) -> (b,c,bh,bw,r,cc),
    # i.e. torch's unfold(2,8,8).unfold(3,8,8) block raster order.
    # (Folding this reorder into the kernel for arbitrary widths would need
    #  cross-sublane shuffles; left to XLA for widths other than 8/16.)
    nbh, nbw = new_h // DCT_N, new_w // DCT_N
    y = out_flat.reshape(Bsz, C, nbh, DCT_N, nbw, DCT_N)
    y = jnp.transpose(y, (0, 1, 2, 4, 3, 5))
    return y.reshape(Bsz, C, -1, new_h, new_w)


def _reference(inputs):
    """Pure-JAX reference: dct->idct is the identity, so the output equals the
    block-ordered padded input raw-viewed as (B, C, -1, new_h, new_w)."""
    Bsz, C, H, W = inputs.shape
    new_h = H + (8 - H % 8) if H % 8 != 0 else H
    new_w = W + (8 - W % 8) if W % 8 != 0 else W
    x = jnp.pad(inputs, ((0, 0), (0, 0), (0, new_h - H), (0, new_w - W)))
    x = x.reshape(Bsz, C, new_h // 8, 8, new_w // 8, 8)
    x = jnp.transpose(x, (0, 1, 2, 4, 3, 5))
    return x.reshape(Bsz, C, -1, new_h, new_w)


if __name__ == "__main__":
    key = jax.random.PRNGKey(0)
    k1, k2 = jax.random.split(key)

    # Fused path (new_w == 16): block reorder folded into the kernel matrix.
    x1 = jax.random.normal(k1, (2, 4, 16, 16), dtype=jnp.float32)
    out1 = jax.block_until_ready(dct_layer_forward(x1))
    assert out1.shape == (2, 4, 1, 16, 16), out1.shape
    err1 = float(jnp.max(jnp.abs(out1 - _reference(x1))))
    assert err1 < 1e-4, err1

    # General path (H padding + post-kernel block reorder), new_h = new_w = 24.
    x2 = jax.random.normal(k2, (1, 3, 20, 24), dtype=jnp.float32)
    out2 = jax.block_until_ready(dct_layer_forward(x2))
    assert out2.shape == (1, 3, 1, 24, 24), out2.shape
    err2 = float(jnp.max(jnp.abs(out2 - _reference(x2))))
    assert err2 < 1e-4, err2

    print("KERNEL_OK")
</pallas_src>

<mosaic_0001>
module attributes {stable_mosaic.version = 11 : i64} {
  func.func @_dct_roundtrip_kernel(%arg0: i32, %arg1: memref<16x128xf32, #tpu.memory_space<vmem>>, %arg2: memref<128x128xf32, #tpu.memory_space<vmem>>, %arg3: memref<16x128xf32, #tpu.memory_space<vmem>>) attributes {dimension_semantics = [#tpu.dimension_semantics<parallel>], iteration_bounds = array<i64: 1>, scalar_prefetch = 0 : i64, scratch_operands = 0 : i64, tpu.core_type = #tpu.core_type<tc>, window_params = [{transform_indices = @transform_0, window_bounds = array<i64: 16, 128>}, {pipeline_mode = #tpu.pipeline_mode<synchronous>, transform_indices = @transform_1, window_bounds = array<i64: 128, 128>}, {transform_indices = @transform_2, window_bounds = array<i64: 16, 128>}]} {
    %c0 = arith.constant 0 : index
    %c0_0 = arith.constant 0 : index
    %0 = vector.load %arg1[%c0, %c0_0] : memref<16x128xf32, #tpu.memory_space<vmem>>, vector<16x128xf32>
    %c0_1 = arith.constant 0 : index
    %c0_2 = arith.constant 0 : index
    %1 = vector.load %arg2[%c0_1, %c0_2] : memref<128x128xf32, #tpu.memory_space<vmem>>, vector<128x128xf32>
    %cst = arith.constant dense<0.000000e+00> : vector<16x128xf32>
    %2 = tpu.matmul %0, %1, %cst {dimension_numbers = #tpu.dot_dimension_numbers<[1], [0], [0], [1], [0, 0, 1, 1], [], []>} : vector<16x128xf32>, vector<128x128xf32>, vector<16x128xf32> -> vector<16x128xf32>
    %c0_3 = arith.constant 0 : index
    %c0_4 = arith.constant 0 : index
    %3 = vector.load %arg3[%c0_3, %c0_4] : memref<16x128xf32, #tpu.memory_space<vmem>>, vector<16x128xf32>
    tpu.vector_store %arg3[%c0_3, %c0_4], %2 {strides = array<i32>} : memref<16x128xf32, #tpu.memory_space<vmem>>, vector<16x128xf32>,
    return
  }
  func.func @transform_0(%arg0: i32) -> (i32, i32) {
    %c0_i32 = arith.constant 0 : i32
    %c0_i32_0 = arith.constant 0 : i32
    return %arg0, %c0_i32 : i32, i32
  }
  func.func @transform_1(%arg0: i32) -> (i32, i32) {
    %c0_i32 = arith.constant 0 : i32
    %c0_i32_0 = arith.constant 0 : i32
    %c0_i32_1 = arith.constant 0 : i32
    return %c0_i32, %c0_i32_0 : i32, i32
  }
  func.func @transform_2(%arg0: i32) -> (i32, i32) {
    %c0_i32 = arith.constant 0 : i32
    %c0_i32_0 = arith.constant 0 : i32
    return %arg0, %c0_i32 : i32, i32
  }
}

</mosaic_0001>

<bundles_post_ra>
// kernel: dct_layer_forward.1
= control target key start
LH: loop header
LB: loop body
LE: loop exit
PB: predicated region body
PF: predicated region fallthrough
CT: control target
= control target key end

     0   :  { %s270_s1 = inlined_call_operand.vmem [shape: f32[128,128], index: 1, kind: input, shape index: {}]   ;;  %s271_s0 = inlined_call_operand.vmem [shape: f32[16,128], index: 0, kind: input, shape index: {}]   ;;  %s272_s2 = inlined_call_operand.vmem [shape: f32[16,128], index: 2, kind: output, shape index: {}]  }
   0x1   :  { %v13_v0 = vld [vmem:[%s270_s1] sm:$0xff]  ;;  %v14_v1 = vld [vmem:[%s270_s1 + $0x8] sm:$0xff]  ;;  %v15_v2 = vld [vmem:[%s270_s1 + $0x10] sm:$0xff] }
   0x2   :  { %v163_v3 = vpack.c.bf16 %v14_v1, %v13_v0  ;;  %v16_v4 = vld [vmem:[%s270_s1 + $0x18] sm:$0xff]  ;;  %v17_v6 = vld [vmem:[%s270_s1 + $0x20] sm:$0xff]  ;;  %v18_v7 = vld [vmem:[%s270_s1 + $0x28] sm:$0xff] }
   0x3   :  { %v167_v5 = vpack.c.bf16 %v16_v4, %v15_v2  ;;  %v171_v8 = vpack.c.bf16 %v18_v7, %v17_v6  ;;  %v11_v9 = vld [vmem:[%s271_s0] sm:$0xff]  ;;  %v19_v10 = vld [vmem:[%s270_s1 + $0x30] sm:$0xff]  ;;  %v20_v11 = vld [vmem:[%s270_s1 + $0x38] sm:$0xff] }
   0x4   :  { %164 = vmatprep.subr.bf16.mxu0 %v163_v3  ;;  %160 = vmatprep.mubr.f32.mxu0 %v11_v9  ;;  %v175_v12 = vpack.c.bf16 %v20_v11, %v19_v10  ;;  %v21_v13 = vld [vmem:[%s270_s1 + $0x40] sm:$0xff]  ;;  %v22_v14 = vld [vmem:[%s270_s1 + $0x48] sm:$0xff]  ;;  %v23_v16 = vld [vmem:[%s270_s1 + $0x50] sm:$0xff] }
   0x5   :  { %166 = vmatpush3.bf16.msra.mxu0 %v163_v3  ;;  %v179_v15 = vpack.c.bf16 %v22_v14, %v21_v13  ;;  %v24_v17 = vld [vmem:[%s270_s1 + $0x58] sm:$0xff]  ;;  %v25_v19 = vld [vmem:[%s270_s1 + $0x60] sm:$0xff]  ;;  %v26_v20 = vld [vmem:[%s270_s1 + $0x68] sm:$0xff] }
   0x6   :  { %168 = vmatprep.subr.bf16.mxu0 %v167_v5  ;;  %v183_v18 = vpack.c.bf16 %v24_v17, %v23_v16  ;;  %v187_v21 = vpack.c.bf16 %v26_v20, %v25_v19  ;;  %v27_v22 = vld [vmem:[%s270_s1 + $0x70] sm:$0xff]  ;;  %v28_v23 = vld [vmem:[%s270_s1 + $0x78] sm:$0xff]  ;;  %v12_v25 = vld [vmem:[%s271_s0 + $0x8] sm:$0xff] }
   0x7   :  { %v191_v24 = vpack.c.bf16 %v28_v23, %v27_v22 }
   0x9   :  { %170 = vmatpush3.bf16.msra.mxu0 %v167_v5 }
   0xa   :  { %172 = vmatprep.subr.bf16.mxu0 %v171_v8 }
   0xd   :  { %174 = vmatpush3.bf16.msra.mxu0 %v171_v8 }
   0xe   :  { %176 = vmatprep.subr.bf16.mxu0 %v175_v12 }
  0x11   :  { %178 = vmatpush3.bf16.msra.mxu0 %v175_v12 }
  0x12   :  { %180 = vmatprep.subr.bf16.mxu0 %v179_v15 }
  0x15   :  { %182 = vmatpush3.bf16.msra.mxu0 %v179_v15 }
  0x16   :  { %184 = vmatprep.subr.bf16.mxu0 %v183_v18 }
  0x19   :  { %186 = vmatpush3.bf16.msra.mxu0 %v183_v18 }
  0x1a   :  { %188 = vmatprep.subr.bf16.mxu0 %v187_v21 }
  0x1d   :  { %190 = vmatpush3.bf16.msra.mxu0 %v187_v21 }
  0x1e   :  { %192 = vmatprep.subr.bf16.mxu0 %v191_v24 }
  0x21   :  { %194 = vmatpush3.bf16.msra.mxu0 %v191_v24 }
  0x24   :  { %161 = vmatmul.mubr.f32.vlgmr.msra.gmra.mrb[0].mxu0 %v12_v25 }
  0xf7   :  { %v162_v26 = vpop.f32.mrb[0].mxu0 }
  0xf8   :  { %105 = vst [vmem:[%s272_s2 + $0x8] sm:$0xff] %v162_v26  ;;  %v95_v27 = vpop.f32.mrb[1].mxu0 }
  0xf9   :  { %104 = vst [vmem:[%s272_s2] sm:$0xff] %v95_v27 }

</bundles_post_ra>
